<compile_context>
chip_gen: v7x
topology: tpu7x:2x2x1
jax: 0.10.0
libtpu: 0.0.40
codegen_flags: <defaults>
</compile_context>

<pallas_src>
import functools

import jax
import jax.numpy as jnp
from jax import lax
from jax.experimental import pallas as pl
from jax.experimental.pallas import tpu as pltpu


# ----------------------------------------------------------------------------
# Kernel: ReLU + Conv(Kx1) + Conv(1xK) + per-step BN partial stats.
# block_n images per grid step; channels on sublanes, flat spatial
# (n_local*H*W + h*W + w) on lanes.
# ----------------------------------------------------------------------------
def _fac_conv_kernel(x_ref, w1_ref, w2_ref, y_ref, stat_ref, *,
                     K, W, S, H1, W1, block_n, mxu_dtype):
    # x_ref   : (block_n, Cin, S)      block_n images, flat spatial on lanes
    # w1_ref  : (Cin,  K*Cin)          fused Kx1 weights,  [co, k*Cin+ci] = w1[k,ci,co]
    # w2_ref  : (Cout, K*Cin)          fused 1xK weights,  [co, k*Cin+ci] = w2[k,ci,co]
    # y_ref   : (Cout, block_n*S)      pre-BN output (junk where h>=H1 or w>=W1)
    # stat_ref: (Cout, 2)              per-step [sum, sum-of-squares] over valid cols
    L = block_n * S

    xr = jnp.maximum(x_ref[...], 0.0)                  # ReLU, kept f32 for the VPU

    # Flatten to (Cin, block_n*S).  Per-image slabs are lane-tile aligned
    # (S % 128 == 0 here), so this is vreg relabeling, not a real relayout.
    if block_n == 1:
        xf = xr[0]
    else:
        xf = jnp.concatenate([xr[n] for n in range(block_n)], axis=-1)

    def make_taps(a, step):
        # Tap k == lane rotation by k*step (i.e. element j reads j + k*step with
        # wrap).  Wrap / cross-image junk only reaches masked/cropped positions.
        pieces = [a]
        for k in range(1, K):
            pieces.append(pltpu.roll(a, shift=L - k * step, axis=1))
        return jnp.concatenate(pieces, axis=0).astype(mxu_dtype)   # (K*Cin, L)

    # ---- Conv (K x 1): row shift = k*W lanes -> ONE fused MXU matmul --------
    mid = jnp.dot(w1_ref[...], make_taps(xf, W),
                  preferred_element_type=jnp.float32)              # (Cin, L)

    # ---- Conv (1 x K): column shift = k lanes -> ONE fused MXU matmul -------
    y = jnp.dot(w2_ref[...], make_taps(mid, 1),
                preferred_element_type=jnp.float32)                # (Cout, L)

    y_ref[...] = y.astype(y_ref.dtype)                 # lane-dense, unmasked store

    # ---- single-pass BN partial statistics over valid output positions ------
    col = lax.broadcasted_iota(jnp.int32, (1, L), 1)
    valid = ((col % W) < W1) & ((col % S) < H1 * W)    # w < W1 and h < H1
    ym = jnp.where(valid, y, 0.0)
    stat_ref[...] = jnp.concatenate(
        [jnp.sum(ym, axis=1, keepdims=True),
         jnp.sum(ym * ym, axis=1, keepdims=True)], axis=1)         # one store


def _choose_block_n(N, block_n=None, cap=64):
    """Images per grid step: largest divisor of N that keeps >=2 grid steps
    (megacore sharding on v7x) and a modest VMEM footprint."""
    if block_n is not None:
        assert N % block_n == 0, (N, block_n)
        return block_n
    best = 1
    for nb in range(1, min(N, cap) + 1):
        if N % nb == 0 and (N // nb >= 2 or N == 1):
            best = nb
    return best


# ----------------------------------------------------------------------------
# Wrapper
# ----------------------------------------------------------------------------
def fac_conv_forward(x_nchw, w1, w2, gamma, beta, *, stride=1, padding=0,
                     eps=1e-5, mxu_dtype=jnp.float32, block_n=None):
    assert stride == 1 and padding == 0, "only stride=1, padding=0 supported"
    N, Cin, H, W = x_nchw.shape
    K = w1.shape[0]
    Cout = w2.shape[2]
    H1 = H - K + 1
    W1 = W - K + 1
    S = H * W

    Nb = _choose_block_n(N, block_n)
    G = N // Nb
    if G > 1 and (Nb * S) % 128 != 0:
        # TODO(synk): pad / tile spatial sizes that are not lane-tile friendly.
        Nb, G = N, 1

    # NCHW already has channels before spatial -> free reshape, no transpose.
    x2 = x_nchw.reshape(N, Cin, S).astype(jnp.float32)

    # Fused tap-major weights (tiny): column index = k*Cin + ci.
    w1c = jnp.transpose(w1, (2, 0, 1)).reshape(Cin, K * Cin).astype(mxu_dtype)
    w2c = jnp.transpose(w2, (2, 0, 1)).reshape(Cout, K * Cin).astype(mxu_dtype)

    kernel = functools.partial(
        _fac_conv_kernel, K=K, W=W, S=S, H1=H1, W1=W1, block_n=Nb,
        mxu_dtype=mxu_dtype)

    y_flat, stats = pl.pallas_call(
        kernel,
        out_shape=(
            jax.ShapeDtypeStruct((Cout, N * S), jnp.float32),   # pre-BN y, flat
            jax.ShapeDtypeStruct((G, Cout, 2), jnp.float32),    # per-step [sum,sumsq]
        ),
        grid=(G,),
        in_specs=[
            pl.BlockSpec((Nb, Cin, S), lambda g: (g, 0, 0)),
            pl.BlockSpec((Cin, K * Cin), lambda g: (0, 0)),
            pl.BlockSpec((Cout, K * Cin), lambda g: (0, 0)),
        ],
        out_specs=(
            pl.BlockSpec((Cout, Nb * S), lambda g: (0, g)),
            pl.BlockSpec((None, Cout, 2), lambda g: (g, 0, 0)),
        ),
        compiler_params=pltpu.CompilerParams(
            dimension_semantics=("parallel",)),
    )(x2, w1c, w2c)

    # Tiny (G, Cout, 2) reduction + BN scale/shift in XLA (negligible).
    tot = jnp.sum(stats, axis=0)                                # (Cout, 2)
    cnt = jnp.float32(N * H1 * W1)
    mean = tot[:, 0] / cnt
    var = jnp.maximum(tot[:, 1] / cnt - mean * mean, 0.0)       # biased (PyTorch BN fwd)
    scale = gamma.astype(jnp.float32) * lax.rsqrt(var + eps)
    shift = beta.astype(jnp.float32) - mean * scale

    # BN affine fuses with the final transpose + crop copy; junk columns are
    # finite and get discarded here.
    out = y_flat * scale[:, None] + shift[:, None]              # (Cout, N*S)
    out = jnp.transpose(out.reshape(Cout, N, H, W), (1, 0, 2, 3))
    return out[:, :, :H1, :W1]


# ----------------------------------------------------------------------------
# Pure-JAX reference (correctness check)
# ----------------------------------------------------------------------------
def fac_conv_reference(x_nchw, w1, w2, gamma, beta, *, eps=1e-5):
    xr = jnp.maximum(x_nchw, 0.0)
    w1_oihw = jnp.transpose(w1, (2, 1, 0))[..., None]           # (co, ci, K, 1)
    mid = lax.conv_general_dilated(
        xr, w1_oihw, window_strides=(1, 1), padding="VALID",
        dimension_numbers=("NCHW", "OIHW", "NCHW"))
    w2_oihw = jnp.transpose(w2, (2, 1, 0))[:, :, None, :]       # (co, ci, 1, K)
    y = lax.conv_general_dilated(
        mid, w2_oihw, window_strides=(1, 1), padding="VALID",
        dimension_numbers=("NCHW", "OIHW", "NCHW"))
    mean = jnp.mean(y, axis=(0, 2, 3), keepdims=True)
    var = jnp.mean((y - mean) ** 2, axis=(0, 2, 3), keepdims=True)
    g = gamma.reshape(1, -1, 1, 1)
    b = beta.reshape(1, -1, 1, 1)
    return (y - mean) * lax.rsqrt(var + eps) * g + b


if __name__ == "__main__":
    # Small shapes consistent with the module: Cin=4, Cout=8, H=W=16, K=3.
    Cin, Cout, H, W, K = 4, 8, 16, 16, 3

    key = jax.random.PRNGKey(0)
    kx, k1, k2, kx8 = jax.random.split(key, 4)
    w1 = jax.random.normal(k1, (K, Cin, Cin), jnp.float32) * 0.1    # Conv(Kx1)
    w2 = jax.random.normal(k2, (K, Cin, Cout), jnp.float32) * 0.1   # Conv(1xK)
    gamma = jnp.ones((Cout,), jnp.float32)   # BN affine init
    beta = jnp.zeros((Cout,), jnp.float32)

    # Case 1: N=2 (block_n=1 -> 2 grid steps), f32, tight check.
    x = jax.random.normal(kx, (2, Cin, H, W), jnp.float32)
    out = jax.block_until_ready(fac_conv_forward(x, w1, w2, gamma, beta))
    ref = fac_conv_reference(x, w1, w2, gamma, beta)
    assert out.shape == (2, Cout, H - K + 1, W - K + 1), out.shape
    assert float(jnp.max(jnp.abs(out - ref))) < 1e-3, \
        float(jnp.max(jnp.abs(out - ref)))

    # Case 2: batched-images-per-step path (N=8 -> block_n=4, 2 grid steps).
    x8 = jax.random.normal(kx8, (8, Cin, H, W), jnp.float32)
    out8 = jax.block_until_ready(fac_conv_forward(x8, w1, w2, gamma, beta))
    ref8 = fac_conv_reference(x8, w1, w2, gamma, beta)
    assert out8.shape == (8, Cout, H - K + 1, W - K + 1), out8.shape
    assert float(jnp.max(jnp.abs(out8 - ref8))) < 1e-3, \
        float(jnp.max(jnp.abs(out8 - ref8)))

    # Case 3: bf16 MXU operands (perf option for v6e/v7x MXUs); loose tolerance.
    outb = jax.block_until_ready(
        fac_conv_forward(x8, w1, w2, gamma, beta, mxu_dtype=jnp.bfloat16))
    assert outb.shape == out8.shape
    assert float(jnp.max(jnp.abs(outb - ref8))) < 0.25, \
        float(jnp.max(jnp.abs(outb - ref8)))

    print("KERNEL_OK")
</pallas_src>

<mosaic_0001>
module attributes {stable_mosaic.version = 11 : i64} {
  func.func @_fac_conv_kernel(%arg0: i32, %arg1: memref<1x4x256xf32, #tpu.memory_space<vmem>>, %arg2: memref<4x12xf32, #tpu.memory_space<vmem>>, %arg3: memref<8x12xf32, #tpu.memory_space<vmem>>, %arg4: memref<8x256xf32, #tpu.memory_space<vmem>>, %arg5: memref<1x8x2xf32, #tpu.memory_space<vmem>>) attributes {dimension_semantics = [#tpu.dimension_semantics<parallel>], iteration_bounds = array<i64: 2>, scalar_prefetch = 0 : i64, scratch_operands = 0 : i64, tpu.core_type = #tpu.core_type<tc>, window_params = [{transform_indices = @transform_0, window_bounds = array<i64: 1, 4, 256>}, {pipeline_mode = #tpu.pipeline_mode<synchronous>, transform_indices = @transform_1, window_bounds = array<i64: 4, 12>}, {pipeline_mode = #tpu.pipeline_mode<synchronous>, transform_indices = @transform_2, window_bounds = array<i64: 8, 12>}, {transform_indices = @transform_3, window_bounds = array<i64: 8, 256>}, {transform_indices = @transform_4, window_bounds = array<i64: 1, 8, 2>}]} {
    %c0 = arith.constant 0 : index
    %c0_0 = arith.constant 0 : index
    %c0_1 = arith.constant 0 : index
    %0 = vector.load %arg1[%c0, %c0_0, %c0_1] : memref<1x4x256xf32, #tpu.memory_space<vmem>>, vector<1x4x256xf32>
    %cst = arith.constant 0.000000e+00 : f32
    %1 = vector.broadcast %cst : f32 to vector<1x4x256xf32>
    %2 = arith.maximumf %0, %1 : vector<1x4x256xf32>
    %3 = vector.shape_cast %2 : vector<1x4x256xf32> to vector<4x256xf32>
    %c0_2 = arith.constant 0 : index
    %c0_3 = arith.constant 0 : index
    %4 = vector.load %arg2[%c0_2, %c0_3] : memref<4x12xf32, #tpu.memory_space<vmem>>, vector<4x12xf32>
    %c240_i32 = arith.constant 240 : i32
    %5 = tpu.dynamic_rotate %3 by %c240_i32 dim 1 : vector<4x256xf32>, i32 -> vector<4x256xf32>
    %c224_i32 = arith.constant 224 : i32
    %6 = tpu.dynamic_rotate %3 by %c224_i32 dim 1 : vector<4x256xf32>, i32 -> vector<4x256xf32>
    %7 = tpu.concatenate %3, %5, %6 in 0 : vector<4x256xf32>, vector<4x256xf32>, vector<4x256xf32> -> vector<12x256xf32>
    %cst_4 = arith.constant dense<0.000000e+00> : vector<4x256xf32>
    %8 = tpu.matmul %4, %7, %cst_4 {dimension_numbers = #tpu.dot_dimension_numbers<[1], [0], [0], [1], [0, 0, 1, 1], [], []>} : vector<4x12xf32>, vector<12x256xf32>, vector<4x256xf32> -> vector<4x256xf32>
    %c0_5 = arith.constant 0 : index
    %c0_6 = arith.constant 0 : index
    %9 = vector.load %arg3[%c0_5, %c0_6] : memref<8x12xf32, #tpu.memory_space<vmem>>, vector<8x12xf32>
    %c255_i32 = arith.constant 255 : i32
    %10 = tpu.dynamic_rotate %8 by %c255_i32 dim 1 : vector<4x256xf32>, i32 -> vector<4x256xf32>
    %c254_i32 = arith.constant 254 : i32
    %11 = tpu.dynamic_rotate %8 by %c254_i32 dim 1 : vector<4x256xf32>, i32 -> vector<4x256xf32>
    %12 = tpu.concatenate %8, %10, %11 in 0 : vector<4x256xf32>, vector<4x256xf32>, vector<4x256xf32> -> vector<12x256xf32>
    %cst_7 = arith.constant dense<0.000000e+00> : vector<8x256xf32>
    %13 = tpu.matmul %9, %12, %cst_7 {dimension_numbers = #tpu.dot_dimension_numbers<[1], [0], [0], [1], [0, 0, 1, 1], [], []>} : vector<8x12xf32>, vector<12x256xf32>, vector<8x256xf32> -> vector<8x256xf32>
    %c0_8 = arith.constant 0 : index
    %c0_9 = arith.constant 0 : index
    %14 = vector.load %arg4[%c0_8, %c0_9] : memref<8x256xf32, #tpu.memory_space<vmem>>, vector<8x256xf32>
    tpu.vector_store %arg4[%c0_8, %c0_9], %13 {strides = array<i32>} : memref<8x256xf32, #tpu.memory_space<vmem>>, vector<8x256xf32>,
    %15 = tpu.iota {dimensions = array<i32: 1>} : vector<1x256xi32>
    %c16_i32 = arith.constant 16 : i32
    %c0_i32 = arith.constant 0 : i32
    %16 = arith.cmpi eq, %c16_i32, %c0_i32 : i32
    %c1_i32 = arith.constant 1 : i32
    %17 = arith.select %16, %c1_i32, %c16_i32 : i32
    %18 = vector.broadcast %17 : i32 to vector<1x256xi32>
    %19 = arith.remsi %15, %18 : vector<1x256xi32>
    %c0_i32_10 = arith.constant 0 : i32
    %20 = vector.broadcast %c0_i32_10 : i32 to vector<1x256xi32>
    %21 = arith.cmpi ne, %19, %20 : vector<1x256xi32>
    %c0_i32_11 = arith.constant 0 : i32
    %22 = vector.broadcast %c0_i32_11 : i32 to vector<1x256xi32>
    %23 = arith.cmpi slt, %19, %22 : vector<1x256xi32>
    %c0_i32_12 = arith.constant 0 : i32
    %24 = arith.cmpi slt, %17, %c0_i32_12 : i32
    %25 = vector.broadcast %24 : i1 to vector<1x256xi1>
    %26 = vector.broadcast %25 : vector<1x256xi1> to vector<1x256xi1>
    %27 = arith.xori %23, %26 : vector<1x256xi1>
    %28 = arith.andi %27, %21 : vector<1x256xi1>
    %29 = vector.broadcast %17 : i32 to vector<1x256xi32>
    %30 = arith.addi %19, %29 : vector<1x256xi32>
    %31 = arith.select %28, %30, %19 : vector<1x256xi1>, vector<1x256xi32>
    %c14_i32 = arith.constant 14 : i32
    %32 = vector.broadcast %c14_i32 : i32 to vector<1x256xi32>
    %33 = arith.cmpi slt, %31, %32 : vector<1x256xi32>
    %c256_i32 = arith.constant 256 : i32
    %c0_i32_13 = arith.constant 0 : i32
    %34 = arith.cmpi eq, %c256_i32, %c0_i32_13 : i32
    %c1_i32_14 = arith.constant 1 : i32
    %35 = arith.select %34, %c1_i32_14, %c256_i32 : i32
    %36 = vector.broadcast %35 : i32 to vector<1x256xi32>
    %37 = arith.remsi %15, %36 : vector<1x256xi32>
    %c0_i32_15 = arith.constant 0 : i32
    %38 = vector.broadcast %c0_i32_15 : i32 to vector<1x256xi32>
    %39 = arith.cmpi ne, %37, %38 : vector<1x256xi32>
    %c0_i32_16 = arith.constant 0 : i32
    %40 = vector.broadcast %c0_i32_16 : i32 to vector<1x256xi32>
    %41 = arith.cmpi slt, %37, %40 : vector<1x256xi32>
    %c0_i32_17 = arith.constant 0 : i32
    %42 = arith.cmpi slt, %35, %c0_i32_17 : i32
    %43 = vector.broadcast %42 : i1 to vector<1x256xi1>
    %44 = vector.broadcast %43 : vector<1x256xi1> to vector<1x256xi1>
    %45 = arith.xori %41, %44 : vector<1x256xi1>
    %46 = arith.andi %45, %39 : vector<1x256xi1>
    %47 = vector.broadcast %35 : i32 to vector<1x256xi32>
    %48 = arith.addi %37, %47 : vector<1x256xi32>
    %49 = arith.select %46, %48, %37 : vector<1x256xi1>, vector<1x256xi32>
    %c224_i32_18 = arith.constant 224 : i32
    %50 = vector.broadcast %c224_i32_18 : i32 to vector<1x256xi32>
    %51 = arith.cmpi slt, %49, %50 : vector<1x256xi32>
    %52 = arith.andi %33, %51 : vector<1x256xi1>
    %cst_19 = arith.constant 0.000000e+00 : f32
    %53 = vector.shape_cast %52 : vector<1x256xi1> to vector<1x256xi1>
    %54 = vector.broadcast %53 : vector<1x256xi1> to vector<8x256xi1>
    %55 = vector.broadcast %cst_19 : f32 to vector<8x256xf32>
    %56 = arith.select %54, %13, %55 : vector<8x256xi1>, vector<8x256xf32>
    %cst_20 = arith.constant dense<0.000000e+00> : vector<8xf32>
    %57 = vector.multi_reduction <add>, %56, %cst_20 [1] : vector<8x256xf32> to vector<8xf32>
    %58 = vector.shape_cast %57 : vector<8xf32> to vector<8x1xf32>
    %59 = arith.mulf %56, %56 : vector<8x256xf32>
    %cst_21 = arith.constant dense<0.000000e+00> : vector<8xf32>
    %60 = vector.multi_reduction <add>, %59, %cst_21 [1] : vector<8x256xf32> to vector<8xf32>
    %61 = vector.shape_cast %60 : vector<8xf32> to vector<8x1xf32>
    %62 = tpu.concatenate %58, %61 in 1 : vector<8x1xf32>, vector<8x1xf32> -> vector<8x2xf32>
    %c0_22 = arith.constant 0 : index
    %c0_23 = arith.constant 0 : index
    %c0_24 = arith.constant 0 : index
    %63 = vector.load %arg5[%c0_22, %c0_23, %c0_24] : memref<1x8x2xf32, #tpu.memory_space<vmem>>, vector<1x8x2xf32>
    %64 = vector.shape_cast %63 : vector<1x8x2xf32> to vector<8x2xf32>
    %65 = vector.shape_cast %62 : vector<8x2xf32> to vector<1x8x2xf32>
    tpu.vector_store %arg5[%c0_22, %c0_23, %c0_24], %65 {strides = array<i32>} : memref<1x8x2xf32, #tpu.memory_space<vmem>>, vector<1x8x2xf32>,
    return
  }
  func.func @transform_0(%arg0: i32) -> (i32, i32, i32) {
    %c0_i32 = arith.constant 0 : i32
    %c0_i32_0 = arith.constant 0 : i32
    %c0_i32_1 = arith.constant 0 : i32
    return %arg0, %c0_i32, %c0_i32_0 : i32, i32, i32
  }
  func.func @transform_1(%arg0: i32) -> (i32, i32) {
    %c0_i32 = arith.constant 0 : i32
    %c0_i32_0 = arith.constant 0 : i32
    %c0_i32_1 = arith.constant 0 : i32
    return %c0_i32, %c0_i32_0 : i32, i32
  }
  func.func @transform_2(%arg0: i32) -> (i32, i32) {
    %c0_i32 = arith.constant 0 : i32
    %c0_i32_0 = arith.constant 0 : i32
    %c0_i32_1 = arith.constant 0 : i32
    return %c0_i32, %c0_i32_0 : i32, i32
  }
  func.func @transform_3(%arg0: i32) -> (i32, i32) {
    %c0_i32 = arith.constant 0 : i32
    %c0_i32_0 = arith.constant 0 : i32
    return %c0_i32, %arg0 : i32, i32
  }
  func.func @transform_4(%arg0: i32) -> (i32, i32, i32) {
    %c0_i32 = arith.constant 0 : i32
    %c0_i32_0 = arith.constant 0 : i32
    %c0_i32_1 = arith.constant 0 : i32
    return %arg0, %c0_i32, %c0_i32_0 : i32, i32, i32
  }
}

</mosaic_0001>

<bundles_post_ra>
// kernel: tpu_custom_call.1
= control target key start
LH: loop header
LB: loop body
LE: loop exit
PB: predicated region body
PF: predicated region fallthrough
CT: control target
= control target key end

     0   :  { %10 = vsyncpa [#allocation3], 0  ;;  %s1252_s0 = inlined_call_operand.hbm [shape: f32[2,4,256], index: 0, kind: input, shape index: {}]   ;;  %s1253_s1 = inlined_call_operand.hbm [shape: f32[4,12], index: 1, kind: input, shape index: {}]   ;;  %s1254_s2 = inlined_call_operand.hbm [shape: f32[8,12], index: 2, kind: input, shape index: {}]   ;;  %s1255_s3 = inlined_call_operand.hbm [shape: f32[8,512], index: 3, kind: output, shape index: {0}]   ;;  %s1256_s4 = inlined_call_operand.vmem [shape: f32[2,8,2], index: 4, kind: output, shape index: {1}]  }
   0x1   :  { %12 = vsyncpa [#allocation3 + $0x1], 0 }
   0x2   :  { %13 = vsyncpa [#allocation6], 0 }
   0x3   :  { %14 = vsyncpa [#allocation4], 0 }
   0x4   :  { %16 = vsyncpa [#allocation4 + $0x1], 0  ;;  %s1001_s15 = smov 0   ;;  %s1003_s16 = smov 0  }
   0x5   :  { %s1005_s17 = smov 0   ;;  %s1007_s18 = smov 0  }
   0x6 LB: > { %s1022_s19 = sadd.s32 4294967295, %s964_s18   ;;  %s676_s20 = sadd.s32 4294967294, %s964_s18   ;;  %s964_s18 = sphi %s1007_s18, %s1278_s18   ;;  %s960_s17 = sphi %s1005_s17, %s1277_s17   ;;  %s956_s16 = sphi %s1003_s16, %s1276_s16   ;;  %s952_s15 = sphi %s1001_s15, %s1275_s15  }
   0x7   : > { %p42_p0 = scmp.ne.s32.totalorder %s956_s16, %s952_s15  ;;  %p1257_p1 = scmp.eq.s32.totalorder %s1022_s19, 0 }
   0x8   : > { %p114_p3 = scmp.eq.s32.totalorder %s676_s20, 1  ;;  %p677_p5 = scmp.ge.s32.totalorder %s964_s18, 1 }
   0x9   : > { %p1031_p4 = por %p1257_p1, %p42_p0  ;;  %p147_p7 = scmp.lt.s32.totalorder %s964_s18, 3 }
   0xa   : > { %p1036_p6 = por %p114_p3, %p42_p0  ;;  %s966_s24 = smov [#allocation5]  }
   0xb   : > { %s1260_s21 = scalar_select %p1031_p4, 1, 0 }
   0xc   : > { %s1261_s22 = scalar_select %p1036_p6, 1, 0 }
   0xd   : > { %p1041_p8 = pnand %p677_p5, %p147_p7  ;;  %s160_s25 = sshll.u32 %s966_s24, 4  ;;  %s161_s25 = int_to_ptr.vmem [resolvable:$true] %s160_s25 }
   0xe   : > { %s967_s26 = smov [#allocation7]   ;;  %s1057_s29 = sadd.s32 1, %s964_s18  }
   0xf   : > { %s1262_s23 = scalar_select %p1041_p8, 1, 0 }
  0x10   : > { %p727_p10 = pneg %p1041_p8  ;;  %s171_s27 = sshll.u32 %s967_s26, 4  ;;  %s1054_s27 = int_to_ptr.vmem [resolvable:$true] %s171_s27 }
  0x11   : > { %s26_s30 = ssub.s32 %s964_s18, %s1057_s29  ;;  %s808_s7 = scalar_lea.hbm %s1253_s1, 64 }
  0x12   : > { %p1050_p11 = pnand %p727_p10, %p1257_p1  ;;  %p809_p12 = scmp.ne.s32.totalorder %s1253_s1, %s808_s7 }
  0x13   : > { %p815_p5 = scmp.lt.u32.totalorder %s808_s7, %s1253_s1 }
  0x14   : > { %p810_p13 = pneg %p1050_p11 }
  0x16   : > { %p811_p0 = pnand %p810_p13, %p809_p12 }
  0x18   : > { %p812_p3 = pneg %p811_p0 }
  0x1a   : > { %p817_p7 = pnand %p815_p5, %p812_p3 }
  0x1c   : > { %820 = shalt.err (!%p817_p7)
}
  0x1d   : > { %s821_s12 = scalar_lea.vmem %s161_s25, 64  ;;  %p829_p2 = scmp.lt.s32.totalorder %s161_s25, %s161_s25 }
  0x1e   : > { %p822_p10 = scmp.ne.s32.totalorder %s161_s25, %s821_s12  ;;  %p830_p6 = scmp.lt.s32.totalorder %s821_s12, %s821_s12 }
  0x20   : > { %p824_p9 = pnand %p822_p10, %p810_p13  ;;  %p831_p4 = por %p830_p6, %p829_p2 }
  0x22   : > { %p825_p1 = pneg %p824_p9 }
  0x24   : > { %p832_p8 = pnand %p831_p4, %p825_p1 }
  0x26   : > { %835 = shalt.err (!%p832_p8)
}
  0x27   : > { %730 = dma.hbm_to_vmem [thread:$0]  (!%p1050_p11), %s1253_s1, 64, %s161_s25, [#allocation6]  }
  0x28   : > { %s836_s26 = scalar_lea.hbm %s1254_s2, 128 }
  0x29   : > { %p837_p9 = scmp.ne.s32.totalorder %s1254_s2, %s836_s26  ;;  %p843_p4 = scmp.lt.u32.totalorder %s836_s26, %s1254_s2 }
  0x2b   : > { %p839_p2 = pnand %p837_p9, %p810_p13 }
  0x2d   : > { %p840_p1 = pneg %p839_p2 }
  0x2f   : > { %p845_p6 = pnand %p843_p4, %p840_p1 }
  0x31   : > { %848 = shalt.err (!%p845_p6)
}
  0x32   : > { %s849_s25 = scalar_lea.vmem %s1054_s27, 128  ;;  %p857_p3 = scmp.lt.s32.totalorder %s1054_s27, %s1054_s27 }
  0x33   : > { %p850_p8 = scmp.ne.s32.totalorder %s1054_s27, %s849_s25  ;;  %p858_p5 = scmp.lt.s32.totalorder %s849_s25, %s849_s25 }
  0x35   : > { %p852_p12 = pnand %p850_p8, %p810_p13  ;;  %p859_p7 = por %p858_p5, %p857_p3 }
  0x37   : > { %p853_p0 = pneg %p852_p12 }
  0x39   : > { %p860_p10 = pnand %p859_p7, %p853_p0 }
  0x3b   : > { %863 = shalt.err (!%p860_p10)
}
  0x3c   : > { %733 = dma.hbm_to_vmem [thread:$0]  (!%p1050_p11), %s1254_s2, 128, %s1054_s27, [#allocation6]  }
  0x3d   : > { %p27_p13 = scmp.eq.s32.totalorder %s26_s30, 0  ;;  %s29_s11 = sadd.s32 1, %s960_s17 }
  0x3e   : > { %p36_p9 = scmp.ne.s32.totalorder %s960_s17, %s956_s16  ;;  %p37_p2 = scmp.eq.s32.totalorder %s964_s18, 0 }
  0x3f   : > { %s1116_s28 = scalar_select %p27_p13, %s960_s17, %s29_s11  }
  0x40   : > { %p38_p1 = por %p37_p2, %p36_p9  ;;  %p1264_p4 = scmp.eq.s32.totalorder %s1022_s19, 1 }
  0x41   : > { %p744_p8 = scmp.lt.s32.totalorder %s964_s18, 2  ;;  %s182_s13 = sand.u32 1, %s960_s17  }
  0x42   : > { %p1120_p6 = por %p1264_p4, %p36_p9  ;;  %s681_s14 = sshll.u32 %s182_s13, 3 }
  0x43   : > { %s701_s20 = sshll.u32 %s964_s18, 7  ;;  %s186_s30 = scalar_lea.vmem [#allocation2], %s681_s14 }
  0x44   : > { %s1130_s27 = scalar_lea.hbm %s1252_s0, %s701_s20  ;;  %s194_s5 = sshll.u32 %s186_s30, 4  ;;  %s1132_s5 = int_to_ptr.vmem [resolvable:$true] %s194_s5 }
  0x45   : > { %p1134_p11 = pnand %p744_p8, %p38_p1  ;;  %s183_s7 = scalar_lea.sflag [#allocation3], %s182_s13 }
  0x46   : > { %s864_s8 = scalar_lea.hbm %s1130_s27, 128  ;;  %s869_s10 = scalar_lea.hbm %s1252_s0, 256 }
  0x47   : > { %p865_p12 = scmp.ne.s32.totalorder %s1130_s27, %s864_s8  ;;  %p866_p0 = pneg %p1134_p11 }
  0x48   : > { %p870_p7 = scmp.lt.u32.totalorder %s1130_s27, %s1252_s0  ;;  %p871_p10 = scmp.lt.u32.totalorder %s869_s10, %s864_s8 }
  0x49   : > { %p867_p3 = pnand %p866_p0, %p865_p12  ;;  %p873_p9 = scmp.lt.u32.totalorder %s864_s8, %s1130_s27 }
  0x4a   : > { %p872_p13 = por %p871_p10, %p870_p7 }
  0x4b   : > { %p868_p5 = pneg %p867_p3 }
  0x4c   : > { %p874_p2 = por %p873_p9, %p872_p13 }
  0x4e   : > { %p875_p1 = pnand %p874_p2, %p868_p5 }
  0x50   : > { %878 = shalt.err (!%p875_p1)
}
  0x51   : > { %s879_s13 = scalar_lea.vmem %s1132_s5, 128  ;;  %s968_s20 = smov [#allocation2]  }
  0x52   : > { %p880_p4 = scmp.ne.s32.totalorder %s1132_s5, %s879_s13  ;;  %s884_s24 = sshll.u32 %s968_s20, 4  ;;  %s885_s24 = int_to_ptr.vmem [resolvable:$false] %s884_s24 }
  0x53   : > { %s886_s26 = scalar_lea.vmem %s885_s24, 256  ;;  %p887_p3 = scmp.lt.s32.totalorder %s1132_s5, %s885_s24 }
  0x54   : > { %p882_p8 = pnand %p880_p4, %p866_p0  ;;  %p888_p7 = scmp.lt.s32.totalorder %s886_s26, %s879_s13 }
  0x56   : > { %p883_p12 = pneg %p882_p8  ;;  %p889_p10 = por %p888_p7, %p887_p3 }
  0x58   : > { %p890_p13 = pnand %p889_p10, %p883_p12 }
  0x5a   : > { %893 = shalt.err (!%p890_p13)
}
  0x5b   : > { %737 = dma.hbm_to_vmem [thread:$0]  (!%p1134_p11), %s1130_s27, 128, %s1132_s5, %s183_s7  }
  0x5c   : > { %p1267_p5 = scmp.ne.s32.totalorder %s1262_s23, 0 }
  0x5d   : > { %s1166_s30 = sand.u32 (!%p1267_p5), 1, %s956_s16   ;;  %p1268_p0 = scmp.ne.s32.totalorder (!%p1267_p5), %s1260_s21, 0 }
  0x5e   : > { %203 = sbr.rel (%p1267_p5) target bundleno = 945 (0x3b1), region = 32  ;;  %s685_s8 = sshll.u32 (!%p1267_p5), %s1166_s30, 3 }
  0x5f   : > { %s206_s25 = scalar_lea.sflag (!%p1267_p5), [#allocation3], %s1166_s30  ;;  %s209_s9 = scalar_lea.vmem (!%p1267_p5), [#allocation2], %s685_s8 }
  0x65   : > { %939 = dma.done.wait (%p1268_p0), %s206_s25, 128  }
  0x66   : > { %941 = vsyncadd (%p1268_p0), %s206_s25, 4294967168  ;;  %p1269_p9 = scmp.eq.s32.totalorder %s1022_s19, 0 }
  0x68   : > { %943 = dma.done.wait (%p1269_p9), [#allocation6], 192   ;;  %p1270_p11 = pmov %p1269_p9 }
  0x69   : > { %v251_v0 = vld [vmem:[%s209_s9] sm:$0xff]  ;;  %v969_v4 = vmov 0.0   ;;  %s970_s23 = smov 112   ;;  %s971_s27 = smov 96   ;;  %v261_v5 = vlaneseq  ;;  %vm279_vm1 = vcmask 1043456   ;;  %vm972_vm3 = vmmov 1  }
  0x6a   : > { %945 = vsyncadd (%p1270_p11), [#allocation6], 4294967104  ;;  %v252_v1 = vmax.f32 %v251_v0, 0.0  ;;  %356 = vmatprep.mubr.f32.mxu0 %v969_v4  ;;  %459 = vmatprep.mubr.f32.mxu1 %v969_v4  ;;  %v253_v24 = vld [vmem:[#allocation5] sm:$0xf]  ;;  %vm282_vm5 = vcmask 97280  }
  0x6b   : > { %v1178_v6 = vand.u32 127, %v261_v5  ;;  %vm1185_vm4 = vmpackc.low %vm279_vm1, %vm972_vm3  ;;  %s973_s21 = smov 127   ;;  %s974_s5 = smov 126   ;;  %v363_v44 = vld [vmem:[#allocation7] sm:$0xff] }
  0x6c   : > { %v255_v2 = vcombine.high %v252_v1, %v252_v1  ;;  %s688_s6 = sshll.u32 %s1166_s30, 4  ;;  %s702_s11 = sshll.u32 %s1022_s19, 8 }
  0x6d   : > { %vm263_vm0 = vcmp.lt.s32.totalorder %v1178_v6, 112  ;;  %vm270_vm2 = vcmp.lt.s32.totalorder %v1178_v6, 96  ;;  %vm368_vm6 = vcmp.lt.s32.totalorder %v1178_v6, 127  ;;  %vm375_vm7 = vcmp.lt.s32.totalorder %v1178_v6, 126  ;;  %s239_s7 = scalar_lea.vmem [#allocation8], %s688_s6  ;;  %s558_s20 = scalar_lea.hbm %s1255_s3, %s702_s11 }
  0x6e   : > { %v788_v3 = vpack.i.bf16 %v255_v2, %v252_v1  ;;  %v468_v45 = vadd.s32 128, %v1178_v6  ;;  %v473_v48 = vand.u32 15, %v1178_v6  ;;  %s560_s10 = sshll.u32 %s239_s7, 4  ;;  %s542_s24 = scalar_lea.sflag [#allocation4], %s1166_s30  ;;  %s1206_s10 = int_to_ptr.vmem [resolvable:$true] %s560_s10 }
  0x6f   : > { %s894_s26 = scalar_lea.vmem %s1206_s10, 256  ;;  %s975_s8 = smov [#allocation8]  }
  0x70   : > { %789 = vrot.lane.b32.xlu0 %v788_v3, %s970_s23  ;;  %v480_v46 = vand.u32 15, %v468_v45  ;;  %v506_v47 = vand.u32 255, %v468_v45  ;;  %vm493_vm10 = vcmp.lt.s32.totalorder %v473_v48, 14  ;;  %p895_p2 = scmp.ne.s32.totalorder %s1206_s10, %s894_s26  ;;  %s898_s25 = sshll.u32 %s975_s8, 4  ;;  %s899_s25 = int_to_ptr.vmem [resolvable:$false] %s898_s25 }
  0x71   : > { %s900_s9 = scalar_lea.vmem %s899_s25, 512  ;;  %p901_p8 = scmp.lt.s32.totalorder %s1206_s10, %s899_s25 }
  0x72   : > { %vm494_vm8 = vcmp.lt.s32.totalorder %v480_v46, 14  ;;  %vm520_vm9 = vcmp.lt.s32.totalorder %v506_v47, 224  ;;  %p896_p1 = pnand %p895_p2, %p1120_p6  ;;  %p902_p12 = scmp.lt.s32.totalorder %s900_s9, %s894_s26 }
  0x73   : > { %vm522_vm11 = vmand %vm494_vm8, %vm520_vm9 }
  0x74   : > { %794 = vrot.lane.b32.xlu0 %v788_v3, %s971_s27  ;;  %p897_p4 = pneg %p896_p1  ;;  %p903_p3 = por %p902_p12, %p901_p8 }
  0x76   : > { %p904_p7 = pnand %p903_p3, %p897_p4 }
  0xe2   : > { %v790_v7 = vpop.permute.xlu0 %789 }
  0xe3   : > { %v792_v8 = vunpack.i.h.bf16 %v790_v7  ;;  %v791_v9 = vunpack.i.l.bf16 %v790_v7 }
  0xe5   : > { %v264_v10 = vsel %vm263_vm0, %v791_v9, %v792_v8  ;;  %v265_v11 = vsel %vm263_vm0, %v792_v8, %v791_v9 }
  0xe6   : > { %v275_v12 = vrot.slane %v264_v10, 4  ;;  %v276_v13 = vrot.slane %v265_v11, 4  ;;  %v795_v14 = vpop.permute.xlu0 %794 }
  0xe7   : > { %v797_v15 = vunpack.i.h.bf16 %v795_v14  ;;  %v796_v16 = vunpack.i.l.bf16 %v795_v14 }
  0xe8   : > { %v281_v17 = vsel %vm279_vm1, %v255_v2, %v276_v13  ;;  %v280_v18 = vsel %vm279_vm1, %v252_v1, %v275_v12 }
  0xe9   : > { %v272_v19 = vsel %vm270_vm2, %v797_v15, %v796_v16  ;;  %v271_v21 = vsel %vm270_vm2, %v796_v16, %v797_v15 }
  0xea   : > { %v703_v22 = vpack.c.bf16 %v272_v19, %v281_v17  ;;  %v706_v23 = vpack.c.bf16 %v271_v21, %v280_v18 }
  0xec   : > { %705 = vmatprep.subr.msk.bf16.mxu0 %vm1185_vm4, %v703_v22 }
  0xed   : > { %708 = vmatpush1.bf16.msk.msra.mxu0 %vm1185_vm4, %v706_v23 }
  0xf0   : > { %692 = vmatmul.mubr.msk.f32.vlgmr.msra.gmra.mrb[0].mxu0 %vm282_vm5, %v253_v24 }
 0x1c3   : > { %v358_v25 = vpop.f32.mrb[0].mxu0 }
 0x1c4   : > { %v360_v26 = vpop.f32.mrb[1].mxu0 }
 0x1c5   : > { %v803_v27 = vpack.i.bf16 %v360_v26, %v358_v25 }
 0x1c7   : > { %799 = vrot.lane.b32.xlu1 %v803_v27, %s973_s21 }
 0x1cb   : > { %804 = vrot.lane.b32.xlu1 %v803_v27, %s974_s5 }
 0x239   : > { %v800_v28 = vpop.permute.xlu1 %799 }
 0x23a   : > { %v802_v29 = vunpack.i.h.bf16 %v800_v28  ;;  %v801_v30 = vunpack.i.l.bf16 %v800_v28 }
 0x23c   : > { %v369_v31 = vsel %vm368_vm6, %v801_v30, %v802_v29  ;;  %v370_v32 = vsel %vm368_vm6, %v802_v29, %v801_v30 }
 0x23d   : > { %v380_v33 = vrot.slane %v369_v31, 4  ;;  %v381_v34 = vrot.slane %v370_v32, 4  ;;  %v805_v35 = vpop.permute.xlu1 %804 }
 0x23e   : > { %v807_v36 = vunpack.i.h.bf16 %v805_v35  ;;  %v806_v37 = vunpack.i.l.bf16 %v805_v35 }
 0x23f   : > { %v385_v38 = vsel %vm279_vm1, %v360_v26, %v381_v34  ;;  %v384_v39 = vsel %vm279_vm1, %v358_v25, %v380_v33 }
 0x240   : > { %v377_v40 = vsel %vm375_vm7, %v807_v36, %v806_v37  ;;  %v376_v41 = vsel %vm375_vm7, %v806_v37, %v807_v36 }
 0x241   : > { %v709_v42 = vpack.c.bf16 %v377_v40, %v385_v38  ;;  %v712_v43 = vpack.c.bf16 %v376_v41, %v384_v39 }
 0x243   : > { %711 = vmatprep.subr.msk.bf16.mxu1 %vm1185_vm4, %v709_v42 }
 0x244   : > { %714 = vmatpush1.bf16.msk.msra.mxu1 %vm1185_vm4, %v712_v43 }
 0x247   : > { %695 = vmatmul.mubr.msk.f32.vlgmr.msra.gmra.mrb[0].mxu1 %vm282_vm5, %v363_v44 }
 0x31a   : > { %v461_v49 = vpop.f32.mrb[0].mxu1 }
 0x31b   : > { %466 = vst [vmem:[%s239_s7] sm:$0xff] %v461_v49  ;;  %v527_v50 = vsel %vm493_vm10, %v461_v49, 0.0  ;;  %v463_v51 = vpop.f32.mrb[1].mxu1 }
 0x31c   : > { %v532_v52 = vmul.f32 %v527_v50, %v527_v50  ;;  %467 = vst [vmem:[%s239_s7 + $0x8] sm:$0xff] %v463_v51  ;;  %v528_v53 = vsel %vm522_vm11, %v463_v51, 0.0 }
 0x31d   : > { %v533_v54 = vmul.f32 %v528_v53, %v528_v53  ;;  %v529_v55 = vadd.f32 %v528_v53, %v527_v50 }
 0x31f   : > { %530 = vadd.xlane.f32.xlu0 %v529_v55  ;;  %v534_v56 = vadd.f32 %v533_v54, %v532_v52 }
 0x321   : > { %535 = vadd.xlane.f32.xlu1 %v534_v56 }
 0x322   : > { %907 = shalt.err (!%p904_p7)
}
 0x323   : > { %s908_s23 = scalar_lea.hbm %s558_s20, 256  ;;  %s912_s21 = scalar_lea.hbm %s1255_s3, 512 }
 0x324   : > { %p909_p10 = scmp.ne.s32.totalorder %s558_s20, %s908_s23  ;;  %p913_p0 = scmp.lt.u32.totalorder %s558_s20, %s1255_s3 }
 0x325   : > { %p914_p9 = scmp.lt.u32.totalorder %s912_s21, %s908_s23  ;;  %p916_p2 = scmp.lt.u32.totalorder %s908_s23, %s558_s20 }
 0x326   : > { %p910_p13 = pnand %p909_p10, %p1120_p6 }
 0x327   : > { %p915_p11 = por %p914_p9, %p913_p0 }
 0x328   : > { %p911_p5 = pneg %p910_p13 }
 0x329   : > { %p917_p1 = por %p916_p2, %p915_p11 }
 0x32b   : > { %p918_p4 = pnand %p917_p1, %p911_p5 }
 0x32d   : > { %921 = shalt.err (!%p918_p4)
}
 0x32e   : > { %725 = dma.vmem_to_hbm [thread:$0]  (%p1120_p6), %s1206_s10, 256, %s558_s20, %s542_s24   ;;  %vm537_vm12 = vcmask 7168   ;;  %vm539_vm13 = vcmask 15360  }
 0x32f   : > { %p247_p8 = scmp.lt.s32.totalorder %s1022_s19, 1 }
 0x331   : > { %s1280_s19 = smov (!%p247_p8, %s1022_s19), 1 }
 0x332   : > { %s689_s7 = sshll.u32 %s1280_s19, 3 }
 0x333   : > { %s250_s13 = scalar_lea.vmem %s1256_s4, %s689_s7 }
 0x3ac   : > { %v531_v57 = vpop.xlane.xlu0 %530 }
 0x3ae   : > { %v536_v58 = vpop.xlane.xlu1 %535 }
 0x3af   : > { %v538_v59 = vsel %vm537_vm12, %v531_v57, %v536_v58 }
 0x3b0   : > { %540 = vst.msk [vmem:[%s250_s13] sm:$0xff] %vm539_vm13, %v538_v59 }
 0x3b1 PF: > { %s575_s12 = sand.u32 1, %s952_s15   ;;  %p1273_p12 = scmp.ne.s32.totalorder %s1261_s22, 0 }
 0x3b2   : > { %p1274_p6 = scmp.ge.s32.totalorder %s964_s18, 2  ;;  %s576_s10 = scalar_lea.sflag [#allocation4], %s575_s12 }
 0x3b4   : > { %p739_p3 = pnand %p1274_p6, %p1273_p12 }
 0x3b6   : > { %947 = dma.done.wait (!%p739_p3), %s576_s10, 256  }
 0x3b7   : > { %949 = vsyncadd (!%p739_p3), %s576_s10, 4294967040  ;;  %p19_p7 = scmp.ge.s32.totalorder %s1057_s29, 4   ;;  %s1275_s15 = smov %s956_s16 }
 0x3b8   : > { %s1276_s16 = smov %s960_s17  ;;  %s1277_s17 = smov %s1116_s28 }
 0x3b9   : > { %s1278_s18 = smov %s1057_s29  ;;  %21 = sbr.rel (!%p19_p7) target bundleno = 6 (0x6), region = 97 }
 0x3c0   :  { %588 = vsyncpa [#allocation3], 1 }
 0x3c1   :  { %590 = vsyncpa [#allocation3 + $0x1], 1 }
 0x3c2   :  { %591 = vsyncpa [#allocation6], 1 }
 0x3c3   :  { %592 = vsyncpa [#allocation4], 1 }
 0x3c4   :  { %594 = vsyncpa [#allocation4 + $0x1], 1 }

</bundles_post_ra>
